<compile_context>
chip_gen: v7x
topology: tpu7x:2x2x1
jax: 0.10.0
libtpu: 0.0.40
codegen_flags: <defaults>
</compile_context>

<pallas_src>
import functools

import jax
import jax.numpy as jnp
from jax.experimental import pallas as pl
from jax.experimental.pallas import tpu as pltpu


_SUBLANE = 32                      # multiple of sublane quantum for f32/bf16/int8
_HW_TILE_MAX = 2048                # lanes per spatial tile when splitting H*W
_ROW_TILE_MAX = 1024
_BLOCK_BYTES = 4 * 1024 * 1024     # target f32-equivalent bytes per input block
_VMEM_LIMIT = 48 * 1024 * 1024     # raised scoped-VMEM limit; safe on v5e/v6e/v7x


def _pool_kernel(x_ref, *refs, aggregate, n_a, n_m, inv_hw, hw, hw_tile, mask_cols):
    """Streaming avg/max pooling over the flattened spatial axis.

    x_ref : (row_tile, hw_tile) tile of the (rows, hw) input.
    refs  : output refs (1 for "sum", 2 for "cat") followed by the two
            (row_tile, 1) float32 scratch accumulators (running sum, running max).
    """
    if aggregate == "sum":
        o_ref, sum_acc, max_acc = refs
    else:
        avg_ref, max_ref, sum_acc, max_acc = refs

    k = pl.program_id(1)

    @pl.when(k == 0)
    def _init():
        sum_acc[...] = jnp.zeros_like(sum_acc)
        max_acc[...] = jnp.full_like(max_acc, -jnp.inf)

    # f32 accumulation for the mean; the cast is VPU work hidden under the DMA.
    x = x_ref[...].astype(jnp.float32)            # (row_tile, hw_tile)

    if mask_cols:
        # Spatial axis was zero-padded up to a multiple of hw_tile: zeros are
        # harmless for the sum but must be excluded from the max.
        col = jax.lax.broadcasted_iota(jnp.int32, x.shape, 1) + k * hw_tile
        x_max = jnp.where(col < hw, x, -jnp.inf)
    else:
        x_max = x

    sum_acc[...] += jnp.sum(x, axis=-1, keepdims=True)
    max_acc[...] = jnp.maximum(max_acc[...], jnp.max(x_max, axis=-1, keepdims=True))

    @pl.when(k == pl.num_programs(1) - 1)
    def _finalize():
        avg = sum_acc[...] * inv_hw
        mx = max_acc[...]
        if aggregate == "sum":
            # Fused multiplicity handling: sum over poolings == n_a*avg + n_m*max.
            if n_a and n_m:
                res = float(n_a) * avg + float(n_m) * mx
            elif n_a:
                res = float(n_a) * avg
            else:
                res = float(n_m) * mx
            o_ref[...] = res.astype(o_ref.dtype)
        else:
            avg_ref[...] = avg.astype(avg_ref.dtype)
            max_ref[...] = mx.astype(max_ref.dtype)


def _choose_tiles(rows, hw):
    """Pick (row_tile, hw_tile) sized for the HBM roofline on all generations."""
    if hw <= _HW_TILE_MAX:
        hw_tile = hw                    # full spatial extent (no 128 constraint)
    else:
        hw_tile = _HW_TILE_MAX          # multiple of 128 -> valid tiled block dim

    # Largest row tile whose f32-equivalent block stays near _BLOCK_BYTES.
    rt = _BLOCK_BYTES // (hw_tile * 4)
    rt = max(_SUBLANE, min(_ROW_TILE_MAX, (rt // _SUBLANE) * _SUBLANE))

    rows_rounded = pl.cdiv(rows, _SUBLANE) * _SUBLANE
    # Keep at least 2 row tiles when possible so the "parallel" row axis can be
    # sharded across the two TensorCores on v7x.
    if rows_rounded >= 2 * _SUBLANE:
        rt = min(rt, max(_SUBLANE, (rows_rounded // 2 // _SUBLANE) * _SUBLANE))
    rt = min(rt, rows_rounded)
    return rt, hw_tile


def multi_pool2d(x, mode="am", aggregate="sum"):
    """JAX/Pallas equivalent of MultiPool2d(mode, aggregate).forward(x).

    x: (B, C, H, W) array (NCHW, same as PyTorch).
    Returns (B, C, 1, 1) for aggregate="sum", (B, C, 1, len(mode)) for "cat".
    """
    if x.ndim != 4:
        raise ValueError("Expected tensor with shape (b, c, h, w).")
    if aggregate not in ("sum", "cat"):
        raise ValueError("Unknown aggrageation: {}.".format(aggregate))
    if not mode:
        raise ValueError("Empty pooling mode.")
    for m in mode:
        if m not in ("a", "m"):
            # TODO(synk): power poolings are an identity/bug in the reference.
            raise NotImplementedError(
                "Only 'a'/'m' poolings are supported (power pooling is an "
                "identity/bug in the reference)."
            )

    B, C, H, W = x.shape
    rows, hw = B * C, H * W
    x2d = x.reshape(rows, hw)

    row_tile, hw_tile = _choose_tiles(rows, hw)
    rows_p = pl.cdiv(rows, row_tile) * row_tile
    hw_p = pl.cdiv(hw, hw_tile) * hw_tile
    if (rows_p, hw_p) != (rows, hw):
        # Ragged row / spatial tiles: zero-pad (extra rows are sliced off below;
        # padded spatial columns are masked for the max inside the kernel).
        x2d = jnp.pad(x2d, ((0, rows_p - rows), (0, hw_p - hw)))

    grid = (rows_p // row_tile, hw_p // hw_tile)
    mask_cols = hw_p != hw
    n_a, n_m = mode.count("a"), mode.count("m")
    inv_hw = 1.0 / float(hw)

    in_specs = [pl.BlockSpec((row_tile, hw_tile), lambda i, k: (i, k))]
    out_spec = pl.BlockSpec((row_tile, 1), lambda i, k: (i, 0))
    scratch = [pltpu.VMEM((row_tile, 1), jnp.float32),
               pltpu.VMEM((row_tile, 1), jnp.float32)]
    cparams = pltpu.CompilerParams(
        dimension_semantics=("parallel", "arbitrary"),
        vmem_limit_bytes=_VMEM_LIMIT)
    itemsize = jnp.dtype(x.dtype).itemsize
    n_out = 1 if aggregate == "sum" else 2
    cost = pl.CostEstimate(
        flops=2 * rows * hw,
        transcendentals=0,
        bytes_accessed=rows * hw * itemsize + n_out * rows * itemsize)

    kern = functools.partial(
        _pool_kernel, aggregate=aggregate, n_a=n_a, n_m=n_m,
        inv_hw=inv_hw, hw=hw, hw_tile=hw_tile, mask_cols=mask_cols)

    if aggregate == "sum":
        out = pl.pallas_call(
            kern,
            out_shape=jax.ShapeDtypeStruct((rows_p, 1), x.dtype),
            grid_spec=pltpu.PrefetchScalarGridSpec(
                num_scalar_prefetch=0, grid=grid,
                in_specs=in_specs, out_specs=out_spec,
                scratch_shapes=scratch),
            compiler_params=cparams,
            cost_estimate=cost,
        )(x2d)
        return out[:rows].reshape(B, C, 1, 1)

    # aggregate == "cat"
    avg2d, max2d = pl.pallas_call(
        kern,
        out_shape=(jax.ShapeDtypeStruct((rows_p, 1), x.dtype),
                   jax.ShapeDtypeStruct((rows_p, 1), x.dtype)),
        grid_spec=pltpu.PrefetchScalarGridSpec(
            num_scalar_prefetch=0, grid=grid,
            in_specs=in_specs, out_specs=[out_spec, out_spec],
            scratch_shapes=scratch),
        compiler_params=cparams,
        cost_estimate=cost,
    )(x2d)
    pieces = {"a": avg2d[:rows], "m": max2d[:rows]}
    out2d = jnp.concatenate([pieces[m] for m in mode], axis=-1)
    return out2d.reshape(B, C, 1, len(mode))


if __name__ == "__main__":
    key = jax.random.PRNGKey(0)

    # Default MultiPool2d(): mode="am", aggregate="sum".
    B, C, H, W = 2, 4, 16, 16
    x = jax.random.normal(key, (B, C, H, W), dtype=jnp.float32)
    out = jax.block_until_ready(multi_pool2d(x, mode="am", aggregate="sum"))
    assert out.shape == (B, C, 1, 1), out.shape
    ref = (jnp.mean(x, axis=(2, 3), keepdims=True)
           + jnp.max(x, axis=(2, 3), keepdims=True))
    assert jnp.allclose(out, ref, atol=1e-5, rtol=1e-5)

    # "cat" aggregate path.
    out_cat = jax.block_until_ready(multi_pool2d(x, mode="am", aggregate="cat"))
    assert out_cat.shape == (B, C, 1, 2), out_cat.shape
    ref_cat = jnp.concatenate(
        [jnp.mean(x, axis=(2, 3), keepdims=True),
         jnp.max(x, axis=(2, 3), keepdims=True)], axis=-1)
    assert jnp.allclose(out_cat, ref_cat, atol=1e-5, rtol=1e-5)

    # Ragged rows (B*C not a multiple of the tile): exercises row padding.
    x2 = jax.random.normal(jax.random.PRNGKey(1), (3, 5, 7, 9), dtype=jnp.float32)
    out2 = jax.block_until_ready(multi_pool2d(x2, mode="am", aggregate="sum"))
    ref2 = (jnp.mean(x2, axis=(2, 3), keepdims=True)
            + jnp.max(x2, axis=(2, 3), keepdims=True))
    assert out2.shape == (3, 5, 1, 1) and jnp.allclose(out2, ref2, atol=1e-5, rtol=1e-5)

    # Large spatial extent (H*W > hw tile): exercises the multi-step
    # reduction axis, column masking, and repeated-letter fused "sum".
    x3 = jax.random.normal(jax.random.PRNGKey(2), (2, 3, 48, 48), dtype=jnp.float32)
    out3 = jax.block_until_ready(multi_pool2d(x3, mode="aam", aggregate="sum"))
    ref3 = (2.0 * jnp.mean(x3, axis=(2, 3), keepdims=True)
            + jnp.max(x3, axis=(2, 3), keepdims=True))
    assert out3.shape == (2, 3, 1, 1) and jnp.allclose(out3, ref3, atol=1e-4, rtol=1e-5)

    print("KERNEL_OK")
</pallas_src>

<mosaic_0001>
module attributes {stable_mosaic.version = 11 : i64} {
  func.func @_pool_kernel(%arg0: i32, %arg1: i32, %arg2: memref<32x256xf32, #tpu.memory_space<vmem>>, %arg3: memref<32x1xf32, #tpu.memory_space<vmem>>, %arg4: memref<32x1xf32, #tpu.memory_space<vmem>>, %arg5: memref<32x1xf32, #tpu.memory_space<vmem>>) attributes {dimension_semantics = [#tpu.dimension_semantics<parallel>, #tpu.dimension_semantics<arbitrary>], iteration_bounds = array<i64: 1, 1>, scalar_prefetch = 0 : i64, scratch_operands = 2 : i64, tpu.core_type = #tpu.core_type<tc>, window_params = [{transform_indices = @transform_0, window_bounds = array<i64: 32, 256>}, {transform_indices = @transform_1, window_bounds = array<i64: 32, 1>}]} {
    %c0_i32 = arith.constant 0 : i32
    %0 = arith.cmpi eq, %arg1, %c0_i32 : i32
    %1 = arith.extui %0 : i1 to i32
    %c0_i32_0 = arith.constant 0 : i32
    %2 = arith.cmpi ne, %1, %c0_i32_0 : i32
    scf.if %2 {
      %cst_13 = arith.constant 0.000000e+00 : f32
      %17 = vector.broadcast %cst_13 : f32 to vector<32x1xf32>
      %c0_14 = arith.constant 0 : index
      %c0_15 = arith.constant 0 : index
      %18 = vector.load %arg4[%c0_14, %c0_15] : memref<32x1xf32, #tpu.memory_space<vmem>>, vector<32x1xf32>
      tpu.vector_store %arg4[%c0_14, %c0_15], %17 {strides = array<i32>} : memref<32x1xf32, #tpu.memory_space<vmem>>, vector<32x1xf32>,
      %cst_16 = arith.constant 0xFF800000 : f32
      %19 = vector.broadcast %cst_16 : f32 to vector<32x1xf32>
      %c0_17 = arith.constant 0 : index
      %c0_18 = arith.constant 0 : index
      %20 = vector.load %arg5[%c0_17, %c0_18] : memref<32x1xf32, #tpu.memory_space<vmem>>, vector<32x1xf32>
      tpu.vector_store %arg5[%c0_17, %c0_18], %19 {strides = array<i32>} : memref<32x1xf32, #tpu.memory_space<vmem>>, vector<32x1xf32>,
    } else {
    }
    %c0 = arith.constant 0 : index
    %c0_1 = arith.constant 0 : index
    %3 = vector.load %arg2[%c0, %c0_1] : memref<32x256xf32, #tpu.memory_space<vmem>>, vector<32x256xf32>
    %c0_2 = arith.constant 0 : index
    %c0_3 = arith.constant 0 : index
    %4 = vector.load %arg4[%c0_2, %c0_3] : memref<32x1xf32, #tpu.memory_space<vmem>>, vector<32x1xf32>
    %cst = arith.constant dense<0.000000e+00> : vector<32xf32>
    %5 = vector.multi_reduction <add>, %3, %cst [1] : vector<32x256xf32> to vector<32xf32>
    %6 = vector.shape_cast %5 : vector<32xf32> to vector<32x1xf32>
    %7 = arith.addf %4, %6 : vector<32x1xf32>
    %c0_4 = arith.constant 0 : index
    %c0_5 = arith.constant 0 : index
    %8 = vector.load %arg4[%c0_4, %c0_5] : memref<32x1xf32, #tpu.memory_space<vmem>>, vector<32x1xf32>
    tpu.vector_store %arg4[%c0_4, %c0_5], %7 {strides = array<i32>} : memref<32x1xf32, #tpu.memory_space<vmem>>, vector<32x1xf32>,
    %c0_6 = arith.constant 0 : index
    %c0_7 = arith.constant 0 : index
    %9 = vector.load %arg5[%c0_6, %c0_7] : memref<32x1xf32, #tpu.memory_space<vmem>>, vector<32x1xf32>
    %cst_8 = arith.constant dense<0xFF800000> : vector<32xf32>
    %10 = vector.multi_reduction <maximumf>, %3, %cst_8 [1] : vector<32x256xf32> to vector<32xf32>
    %11 = vector.shape_cast %10 : vector<32xf32> to vector<32x1xf32>
    %12 = arith.maximumf %9, %11 : vector<32x1xf32>
    %c0_9 = arith.constant 0 : index
    %c0_10 = arith.constant 0 : index
    %13 = vector.load %arg5[%c0_9, %c0_10] : memref<32x1xf32, #tpu.memory_space<vmem>>, vector<32x1xf32>
    tpu.vector_store %arg5[%c0_9, %c0_10], %12 {strides = array<i32>} : memref<32x1xf32, #tpu.memory_space<vmem>>, vector<32x1xf32>,
    %c0_i32_11 = arith.constant 0 : i32
    %14 = arith.cmpi eq, %arg1, %c0_i32_11 : i32
    %15 = arith.extui %14 : i1 to i32
    %c0_i32_12 = arith.constant 0 : i32
    %16 = arith.cmpi ne, %15, %c0_i32_12 : i32
    scf.if %16 {
      %c0_13 = arith.constant 0 : index
      %c0_14 = arith.constant 0 : index
      %17 = vector.load %arg4[%c0_13, %c0_14] : memref<32x1xf32, #tpu.memory_space<vmem>>, vector<32x1xf32>
      %cst_15 = arith.constant 3.906250e-03 : f32
      %18 = vector.broadcast %cst_15 : f32 to vector<32x1xf32>
      %19 = arith.mulf %17, %18 : vector<32x1xf32>
      %c0_16 = arith.constant 0 : index
      %c0_17 = arith.constant 0 : index
      %20 = vector.load %arg5[%c0_16, %c0_17] : memref<32x1xf32, #tpu.memory_space<vmem>>, vector<32x1xf32>
      %cst_18 = arith.constant 1.000000e+00 : f32
      %21 = vector.broadcast %cst_18 : f32 to vector<32x1xf32>
      %22 = arith.mulf %21, %19 : vector<32x1xf32>
      %cst_19 = arith.constant 1.000000e+00 : f32
      %23 = vector.broadcast %cst_19 : f32 to vector<32x1xf32>
      %24 = arith.mulf %23, %20 : vector<32x1xf32>
      %25 = arith.addf %22, %24 : vector<32x1xf32>
      %c0_20 = arith.constant 0 : index
      %c0_21 = arith.constant 0 : index
      %26 = vector.load %arg3[%c0_20, %c0_21] : memref<32x1xf32, #tpu.memory_space<vmem>>, vector<32x1xf32>
      tpu.vector_store %arg3[%c0_20, %c0_21], %25 {strides = array<i32>} : memref<32x1xf32, #tpu.memory_space<vmem>>, vector<32x1xf32>,
    } else {
    }
    return
  }
  func.func @transform_0(%arg0: i32, %arg1: i32) -> (i32, i32) {
    %c0_i32 = arith.constant 0 : i32
    return %arg0, %arg1 : i32, i32
  }
  func.func @transform_1(%arg0: i32, %arg1: i32) -> (i32, i32) {
    %c0_i32 = arith.constant 0 : i32
    %c0_i32_0 = arith.constant 0 : i32
    return %arg0, %c0_i32 : i32, i32
  }
}

</mosaic_0001>

<bundles_post_ra>
// kernel: tpu_custom_call.1
= control target key start
LH: loop header
LB: loop body
LE: loop exit
PB: predicated region body
PF: predicated region fallthrough
CT: control target
= control target key end

     0   :  { %6 = vsyncpa [#allocation5], 0  ;;  %s149_s6 = smov [#allocation4]   ;;  %s208_s0 = inlined_call_operand.hbm [shape: f32[32,256], index: 0, kind: input, shape index: {}]   ;;  %s209_s1 = inlined_call_operand.vmem [shape: f32[32,1], index: 1, kind: output, shape index: {}]  }
   0x1   :  { %s12_s7 = sshll.u32 %s149_s6, 4  ;;  %s125_s10 = scalar_lea.hbm %s208_s0, 1024  ;;  %s13_s7 = int_to_ptr.vmem [resolvable:$true] %s12_s7 }
   0x2   :  { %p126_p0 = scmp.ne.s32.totalorder %s208_s0, %s125_s10  ;;  %p129_p1 = scmp.lt.u32.totalorder %s125_s10, %s208_s0 }
   0x4   :  { %p131_p2 = pnand %p129_p1, %p126_p0 }
   0x6   :  { %134 = shalt.err (!%p131_p2)
}
   0x7   :  { %s135_s15 = scalar_lea.vmem %s13_s7, 1024  ;;  %p140_p4 = scmp.lt.s32.totalorder %s13_s7, %s13_s7 }
   0x8   :  { %p136_p3 = scmp.ne.s32.totalorder %s13_s7, %s135_s15  ;;  %p141_p5 = scmp.lt.s32.totalorder %s135_s15, %s135_s15 }
   0xa   :  { %p142_p6 = por %p141_p5, %p140_p4 }
   0xc   :  { %p143_p7 = pnand %p142_p6, %p136_p3 }
   0xe   :  { %146 = shalt.err (!%p143_p7)
}
   0xf   :  { %s150_s16 = smov 256   ;;  %s151_s17 = smov 16  }
  0x10   :  { %18 = dma.hbm_to_vmem [thread:$0]  %s208_s0, 1024, %s13_s7, [#allocation5], %s150_s16, %s150_s16, %s151_s17  }
  0x11   :  { %147 = dma.done.wait [#allocation5], 1024  }
  0x12   :  { %148 = vsyncadd [#allocation5], 4294966272  ;;  %vm26_vm0 = vcmask 7168   ;;  %v152_v0 = vmov 0.0   ;;  %v39_v1 = vld [vmem:[#allocation4 + $0x20] sm:$0xff]  ;;  %v40_v2 = vld [vmem:[#allocation4 + $0x28] sm:$0xff] }
  0x13   :  { %29 = vst.msk [vmem:[#allocation2 + $0x10] sm:$0xff] %vm26_vm0, %v152_v0  ;;  %27 = vst.msk [vmem:[#allocation2] sm:$0xff] %vm26_vm0, %v152_v0  ;;  %v35_v3 = vld [vmem:[#allocation4] sm:$0xff]  ;;  %v53_v4 = vadd.f32 %v40_v2, %v39_v1  ;;  %v36_v5 = vld [vmem:[#allocation4 + $0x8] sm:$0xff]  ;;  %v78_v16 = vmax.f32 %v39_v1, %v40_v2  ;;  %v153_v17 = vmov -inf  }
  0x14   :  { %28 = vst.msk [vmem:[#allocation2 + $0x8] sm:$0xff] %vm26_vm0, %v152_v0  ;;  %30 = vst.msk [vmem:[#allocation2 + $0x18] sm:$0xff] %vm26_vm0, %v152_v0  ;;  %v41_v6 = vld [vmem:[#allocation4 + $0x30] sm:$0xff]  ;;  %v42_v7 = vld [vmem:[#allocation4 + $0x38] sm:$0xff]  ;;  %v47_v8 = vadd.f32 %v36_v5, %v35_v3  ;;  %v72_v14 = vmax.f32 %v35_v3, %v36_v5 }
  0x15   :  { %v37_v9 = vld [vmem:[#allocation4 + $0x10] sm:$0xff]  ;;  %v38_v10 = vld [vmem:[#allocation4 + $0x18] sm:$0xff]  ;;  %54 = vadd.xlane.f32.xlu1 %v53_v4  ;;  %v56_v11 = vadd.f32 %v42_v7, %v41_v6  ;;  %v81_v15 = vmax.f32 %v41_v6, %v42_v7  ;;  %32 = vst.msk [vmem:[#allocation3 + $0x8] sm:$0xff] %vm26_vm0, %v153_v17  ;;  %31 = vst.msk [vmem:[#allocation3] sm:$0xff] %vm26_vm0, %v153_v17 }
  0x16   :  { %48 = vadd.xlane.f32.xlu0 %v47_v8  ;;  %v50_v12 = vadd.f32 %v38_v10, %v37_v9  ;;  %v75_v13 = vmax.f32 %v37_v9, %v38_v10  ;;  %33 = vst.msk [vmem:[#allocation3 + $0x10] sm:$0xff] %vm26_vm0, %v153_v17  ;;  %34 = vst.msk [vmem:[#allocation3 + $0x18] sm:$0xff] %vm26_vm0, %v153_v17 }
  0x19   :  { %57 = vadd.xlane.f32.xlu1 %v56_v11 }
  0x1a   :  { %51 = vadd.xlane.f32.xlu0 %v50_v12  ;;  %v45_v18 = vld [vmem:[#allocation2 + $0x10] sm:$0xff]  ;;  %v43_v19 = vld [vmem:[#allocation2] sm:$0xff] }
  0x1b   :  { %v46_v24 = vld [vmem:[#allocation2 + $0x18] sm:$0xff]  ;;  %v44_v25 = vld [vmem:[#allocation2 + $0x8] sm:$0xff] }
  0x1c   :  { %v69_v30 = vld [vmem:[#allocation3 + $0x8] sm:$0xff]  ;;  %v68_v31 = vld [vmem:[#allocation3] sm:$0xff] }
  0x1d   :  { %76 = vmax.xlane.f32.xlu1 %v75_v13  ;;  %v71_v36 = vld [vmem:[#allocation3 + $0x18] sm:$0xff]  ;;  %v70_v37 = vld [vmem:[#allocation3 + $0x10] sm:$0xff] }
  0x1e   :  { %73 = vmax.xlane.f32.xlu0 %v72_v14 }
  0x21   :  { %82 = vmax.xlane.f32.xlu1 %v81_v15 }
  0x22   :  { %79 = vmax.xlane.f32.xlu0 %v78_v16 }
  0xa2   :  { %v55_v20 = vpop.xlane.xlu1 %54 }
  0xa3   :  { %v61_v21 = vadd.f32 %v55_v20, %v45_v18  ;;  %v49_v22 = vpop.xlane.xlu0 %48 }
  0xa4   :  { %v59_v23 = vadd.f32 %v49_v22, %v43_v19 }
  0xa5   :  { %66 = vst.msk [vmem:[#allocation2 + $0x10] sm:$0xff] %vm26_vm0, %v61_v21 }
  0xa6   :  { %64 = vst.msk [vmem:[#allocation2] sm:$0xff] %vm26_vm0, %v59_v23  ;;  %v58_v26 = vpop.xlane.xlu1 %57 }
  0xa7   :  { %v62_v27 = vadd.f32 %v58_v26, %v46_v24  ;;  %v52_v28 = vpop.xlane.xlu0 %51 }
  0xa8   :  { %v60_v29 = vadd.f32 %v52_v28, %v44_v25 }
  0xa9   :  { %67 = vst.msk [vmem:[#allocation2 + $0x18] sm:$0xff] %vm26_vm0, %v62_v27 }
  0xaa   :  { %65 = vst.msk [vmem:[#allocation2 + $0x8] sm:$0xff] %vm26_vm0, %v60_v29  ;;  %v77_v32 = vpop.xlane.xlu1 %76 }
  0xab   :  { %v85_v33 = vmax.f32 %v69_v30, %v77_v32  ;;  %v74_v34 = vpop.xlane.xlu0 %73 }
  0xac   :  { %v84_v35 = vmax.f32 %v68_v31, %v74_v34  ;;  %v97_v48 = vld [vmem:[#allocation2 + $0x10] sm:$0xff] }
  0xad   :  { %89 = vst.msk [vmem:[#allocation3 + $0x8] sm:$0xff] %vm26_vm0, %v85_v33  ;;  %v95_v42 = vld [vmem:[#allocation2] sm:$0xff]  ;;  %v101_v53 = vmul.f32 0.00390625, %v97_v48 }
  0xae   :  { %88 = vst.msk [vmem:[#allocation3] sm:$0xff] %vm26_vm0, %v84_v35  ;;  %v83_v38 = vpop.xlane.xlu1 %82  ;;  %v99_v45 = vmul.f32 0.00390625, %v95_v42 }
  0xaf   :  { %v87_v39 = vmax.f32 %v71_v36, %v83_v38  ;;  %v80_v40 = vpop.xlane.xlu0 %79 }
  0xb0   :  { %v86_v41 = vmax.f32 %v70_v37, %v80_v40  ;;  %v98_v46 = vld [vmem:[#allocation2 + $0x18] sm:$0xff] }
  0xb1   :  { %v96_v43 = vld [vmem:[#allocation2 + $0x8] sm:$0xff]  ;;  %91 = vst.msk [vmem:[#allocation3 + $0x18] sm:$0xff] %vm26_vm0, %v87_v39  ;;  %v102_v52 = vmul.f32 0.00390625, %v98_v46 }
  0xb2   :  { %90 = vst.msk [vmem:[#allocation3 + $0x10] sm:$0xff] %vm26_vm0, %v86_v41  ;;  %v100_v44 = vmul.f32 0.00390625, %v96_v43 }
  0xb4   :  { %v104_v47 = vld [vmem:[#allocation3 + $0x8] sm:$0xff] }
  0xb5   :  { %v108_v49 = vadd.f32 %v104_v47, %v100_v44  ;;  %v103_v50 = vld [vmem:[#allocation3] sm:$0xff] }
  0xb6   :  { %v107_v51 = vadd.f32 %v103_v50, %v99_v45 }
  0xb7   :  { %112 = vst.msk [vmem:[%s209_s1 + $0x8] sm:$0xff] %vm26_vm0, %v108_v49 }
  0xb8   :  { %111 = vst.msk [vmem:[%s209_s1] sm:$0xff] %vm26_vm0, %v107_v51  ;;  %v106_v54 = vld [vmem:[#allocation3 + $0x18] sm:$0xff] }
  0xb9   :  { %v110_v55 = vadd.f32 %v106_v54, %v102_v52  ;;  %v105_v56 = vld [vmem:[#allocation3 + $0x10] sm:$0xff] }
  0xba   :  { %v109_v57 = vadd.f32 %v105_v56, %v101_v53 }
  0xbb   :  { %114 = vst.msk [vmem:[%s209_s1 + $0x18] sm:$0xff] %vm26_vm0, %v110_v55 }
  0xbc   :  { %113 = vst.msk [vmem:[%s209_s1 + $0x10] sm:$0xff] %vm26_vm0, %v109_v57 }
  0xbd   :  { %119 = vsyncpa [#allocation5], 1 }

</bundles_post_ra>
